<compile_context>
chip_gen: v6e
topology: v6e:2x2x1
jax: 0.10.0
libtpu: 0.0.40
codegen_flags: <defaults>
</compile_context>

<pallas_src>
import functools
import math

import jax
import jax.numpy as jnp
from jax.experimental import pallas as pl
from jax.experimental.pallas import tpu as pltpu


def _pe_kernel(inv_freq_ref, parity_ref, o_ref):
    """Writes one (tS, D) tile of the sinusoidal position-encoding table.

    inv_freq_ref: (1, D) f32, exp(-(d - d%2) * ln(10000)/D)  (VMEM-resident)
    parity_ref:   (1, D) f32, d % 2  (0 -> sin lane, 1 -> cos lane)
    o_ref:        (tS, D) output tile
    """
    tS = o_ref.shape[0]
    seq_start = pl.program_id(0) * tS
    pos = (seq_start + jax.lax.broadcasted_iota(jnp.int32, (tS, 1), 0)).astype(
        jnp.float32
    )                                                     # (tS, 1)
    angle = pos * inv_freq_ref[...]                       # (tS, D), all math in f32
    # Exact sin/cos per lane (matches the PyTorch buffer; no phase-shift trick).
    val = jnp.where(parity_ref[...] > 0.5, jnp.cos(angle), jnp.sin(angle))
    o_ref[...] = val.astype(o_ref.dtype)


_BLOCK_BYTES_TARGET = 8 * 1024 * 1024  # ~8 MiB/block; x2 double-buffered = 16 MiB


def _choose_seq_tile(S: int, D: int, itemsize: int) -> int:
    """Pick the sequence tile: ~8 MiB blocks, multiple of 8 rows, and >= 2 grid
    steps when possible so v7x can split the parallel axis across both TCs."""
    bytes_per_row = itemsize * max(D, 1)
    budget_rows = max(8, _BLOCK_BYTES_TARGET // bytes_per_row)
    if S > 8:
        half_rows = max(8, ((-(-S // 2) + 7) // 8) * 8)  # ceil(S/2) rounded up to 8
        if half_rows < S:
            budget_rows = min(budget_rows, half_rows)
    tS = min(S, budget_rows)
    if tS < S:
        tS = max(8, (tS // 8) * 8)  # block rows must be a multiple of 8 unless full-extent
    return tS


def _build_pe_table(max_len: int, dim_model: int, dtype) -> jax.Array:
    S, D = int(max_len), int(dim_model)
    dtype = jnp.dtype(dtype)
    itemsize = dtype.itemsize
    tS = _choose_seq_tile(S, D, itemsize)

    # Hoisted per-feature constants (computed once, tiny).
    d_idx = jnp.arange(D, dtype=jnp.float32)
    parity = jnp.mod(d_idx, 2.0)
    inv_freq = jnp.exp((d_idx - parity) * (-math.log(10000.0) / float(D)))

    pe = pl.pallas_call(
        _pe_kernel,
        out_shape=jax.ShapeDtypeStruct((S, D), dtype),
        grid=(pl.cdiv(S, tS),),
        in_specs=[
            pl.BlockSpec((1, D), lambda i: (0, 0)),  # inv_freq: resident across steps
            pl.BlockSpec((1, D), lambda i: (0, 0)),  # parity:   resident across steps
        ],
        out_specs=pl.BlockSpec((tS, D), lambda i: (i, 0)),
        compiler_params=pltpu.CompilerParams(
            dimension_semantics=("parallel",),       # megacore-safe, no cross-step state
            vmem_limit_bytes=32 * 1024 * 1024,
        ),
        cost_estimate=pl.CostEstimate(
            flops=3 * S * D,
            transcendentals=2 * S * D,
            bytes_accessed=S * D * itemsize + 2 * D * 4,
        ),
    )(inv_freq.reshape(1, D), parity.reshape(1, D))
    return pe


@functools.lru_cache(maxsize=None)
def _pe_table_cached(max_len: int, dim_model: int, dtype_name: str) -> jax.Array:
    # Equivalent of register_buffer('pe', ...): built once, reused every forward.
    return jax.block_until_ready(_build_pe_table(max_len, dim_model, dtype_name))


def sinusoidal_position_encoding(
    x: jax.Array, max_len: int, dim_model: int | None = None, *, table_dtype=jnp.float32
) -> jax.Array:
    """Equivalent of SinusoidalPositionEncoding(max_len, dim_model).forward(x).

    x: (B, S, ...). Returns (B, S, dim_model) positional encodings, identical
    for every batch element — matching pe[:S].unsqueeze(0).expand(B, -1, -1).
    The broadcast stays a free view when consumed inside a jit; standalone it
    materializes B copies (JAX has no non-owning `expand` view).
    """
    B, S = int(x.shape[0]), int(x.shape[1])
    if dim_model is None:
        dim_model = int(x.shape[-1])
    assert S <= max_len, "sequence length exceeds max_len"

    pe = _pe_table_cached(int(max_len), int(dim_model), jnp.dtype(table_dtype).name)
    return jnp.broadcast_to(pe[:S][None], (B, S, dim_model))


def _reference_pe(B: int, S: int, D: int) -> jax.Array:
    # Pure-JAX reference mirroring the PyTorch __init__ construction.
    position = jnp.arange(S, dtype=jnp.float32)[:, None]
    div_term = jnp.exp(
        jnp.arange(0, D, 2, dtype=jnp.float32) * (-math.log(10000.0) / D)
    )
    pe = jnp.zeros((S, D), dtype=jnp.float32)
    pe = pe.at[:, 0::2].set(jnp.sin(position * div_term))
    pe = pe.at[:, 1::2].set(jnp.cos(position * div_term))
    return jnp.broadcast_to(pe[None], (B, S, D))


if __name__ == "__main__":
    key = jax.random.PRNGKey(0)
    B, S, D = 2, 8, 32
    max_len = 16
    x = jax.random.normal(key, (B, S, D), dtype=jnp.float32)

    out = sinusoidal_position_encoding(x, max_len, D)
    out = jax.block_until_ready(out)

    ref = _reference_pe(B, S, D)
    assert out.shape == (B, S, D)
    assert out.dtype == jnp.float32
    assert jnp.allclose(out, ref, atol=1e-5, rtol=1e-5)

    # Second call must hit the cached table (no rebuild) and stay correct.
    out2 = jax.block_until_ready(sinusoidal_position_encoding(x, max_len, D))
    assert jnp.allclose(out2, ref, atol=1e-5, rtol=1e-5)

    print("KERNEL_OK")
</pallas_src>

<mosaic_0001>
module attributes {stable_mosaic.version = 11 : i64} {
  func.func @_pe_kernel(%arg0: i32, %arg1: memref<1x32xf32, #tpu.memory_space<vmem>>, %arg2: memref<1x32xf32, #tpu.memory_space<vmem>>, %arg3: memref<8x32xf32, #tpu.memory_space<vmem>>) attributes {dimension_semantics = [#tpu.dimension_semantics<parallel>], iteration_bounds = array<i64: 2>, scalar_prefetch = 0 : i64, scratch_operands = 0 : i64, tpu.core_type = #tpu.core_type<tc>, window_params = [{pipeline_mode = #tpu.pipeline_mode<synchronous>, transform_indices = @transform_0, window_bounds = array<i64: 1, 32>}, {pipeline_mode = #tpu.pipeline_mode<synchronous>, transform_indices = @transform_1, window_bounds = array<i64: 1, 32>}, {transform_indices = @transform_2, window_bounds = array<i64: 8, 32>}]} {
    %c8_i32 = arith.constant 8 : i32
    %0 = arith.muli %arg0, %c8_i32 : i32
    %1 = tpu.iota {dimensions = array<i32: 0>} : vector<8x1xi32>
    %2 = vector.broadcast %0 : i32 to vector<8x1xi32>
    %3 = arith.addi %2, %1 : vector<8x1xi32>
    %4 = arith.sitofp %3 : vector<8x1xi32> to vector<8x1xf32>
    %c0 = arith.constant 0 : index
    %c0_0 = arith.constant 0 : index
    %5 = vector.load %arg1[%c0, %c0_0] : memref<1x32xf32, #tpu.memory_space<vmem>>, vector<1x32xf32>
    %6 = vector.broadcast %4 : vector<8x1xf32> to vector<8x32xf32>
    %7 = vector.broadcast %5 : vector<1x32xf32> to vector<8x32xf32>
    %8 = arith.mulf %6, %7 : vector<8x32xf32>
    %c0_1 = arith.constant 0 : index
    %c0_2 = arith.constant 0 : index
    %9 = vector.load %arg2[%c0_1, %c0_2] : memref<1x32xf32, #tpu.memory_space<vmem>>, vector<1x32xf32>
    %cst = arith.constant 5.000000e-01 : f32
    %10 = vector.broadcast %cst : f32 to vector<1x32xf32>
    %11 = arith.cmpf ogt, %9, %10 : vector<1x32xf32>
    %12 = math.cos %8 : vector<8x32xf32>
    %13 = math.sin %8 : vector<8x32xf32>
    %14 = vector.shape_cast %11 : vector<1x32xi1> to vector<1x32xi1>
    %15 = vector.broadcast %14 : vector<1x32xi1> to vector<8x32xi1>
    %16 = arith.select %15, %12, %13 : vector<8x32xi1>, vector<8x32xf32>
    %c0_3 = arith.constant 0 : index
    %c0_4 = arith.constant 0 : index
    %17 = vector.load %arg3[%c0_3, %c0_4] : memref<8x32xf32, #tpu.memory_space<vmem>>, vector<8x32xf32>
    tpu.vector_store %arg3[%c0_3, %c0_4], %16 {strides = array<i32>} : memref<8x32xf32, #tpu.memory_space<vmem>>, vector<8x32xf32>,
    return
  }
  func.func @transform_0(%arg0: i32) -> (i32, i32) {
    %c0_i32 = arith.constant 0 : i32
    %c0_i32_0 = arith.constant 0 : i32
    %c0_i32_1 = arith.constant 0 : i32
    return %c0_i32, %c0_i32_0 : i32, i32
  }
  func.func @transform_1(%arg0: i32) -> (i32, i32) {
    %c0_i32 = arith.constant 0 : i32
    %c0_i32_0 = arith.constant 0 : i32
    %c0_i32_1 = arith.constant 0 : i32
    return %c0_i32, %c0_i32_0 : i32, i32
  }
  func.func @transform_2(%arg0: i32) -> (i32, i32) {
    %c0_i32 = arith.constant 0 : i32
    %c0_i32_0 = arith.constant 0 : i32
    return %arg0, %c0_i32 : i32, i32
  }
}

</mosaic_0001>

<bundles_post_ra>
// kernel: tpu_custom_call.1
= control target key start
LH: loop header
LB: loop body
LE: loop exit
PB: predicated region body
PF: predicated region fallthrough
CT: control target
= control target key end

     0   :  { %7 = vsyncpa [#allocation3], 0  ;;  %s783_s0 = inlined_call_operand.hbm [shape: f32[1,32], index: 0, kind: input, shape index: {}]   ;;  %s784_s1 = inlined_call_operand.vmem [shape: f32[1,32], index: 1, kind: input, shape index: {}]   ;;  %s785_s2 = inlined_call_operand.hbm [shape: f32[16,32], index: 2, kind: output, shape index: {}]  }
   0x1   :  { %8 = vsyncpa [#allocation4], 0 }
   0x2   :  { %10 = vsyncpa [#allocation4 + $0x1], 0  ;;  %s641_s9 = smov 0   ;;  %s643_s10 = smov 0  }
   0x3   :  { %s645_s11 = smov 0   ;;  %s647_s12 = smov 0  }
   0x4 LB: > { %s662_s13 = sadd.s32 4294967295, %s615_s12   ;;  %s440_s14 = sadd.s32 4294967294, %s615_s12   ;;  %s615_s12 = sphi %s647_s12, %s792_s12   ;;  %s611_s11 = sphi %s645_s11, %s791_s11   ;;  %s607_s10 = sphi %s643_s10, %s790_s10   ;;  %s603_s9 = sphi %s641_s9, %s789_s9  }
   0x5   : > { %s666_s15 = sadd.s32 1, %s615_s12   ;;  %s65_s16 = sadd.s32 1, %s611_s11 }
   0x6   : > { %s62_s17 = ssub.s32 %s615_s12, %s666_s15  ;;  %p75_p0 = scmp.ne.s32.totalorder %s611_s11, %s607_s10 }
   0x7   : > { %p63_p1 = scmp.eq.s32.totalorder %s62_s17, 0  ;;  %p76_p2 = scmp.eq.s32.totalorder %s662_s13, 1 }
   0x8   : > { %p81_p3 = scmp.ne.s32.totalorder %s607_s10, %s603_s9  ;;  %p82_p4 = scmp.eq.s32.totalorder %s440_s14, 1 }
   0x9   : > { %s677_s18 = scalar_select %p63_p1, %s611_s11, %s65_s16  }
   0xa   : > { %p679_p5 = por %p76_p2, %p75_p0  ;;  %p683_p6 = por %p82_p4, %p81_p3 }
   0xb   : > { %p441_p7 = scmp.ge.s32.totalorder %s615_s12, 1  ;;  %p89_p8 = scmp.lt.s32.totalorder %s615_s12, 3 }
   0xc   : > { %p478_p9 = scmp.eq.s32.totalorder %s662_s13, 0  ;;  %s617_s22 = smov [#allocation2]  }
   0xd   : > { %p690_p10 = pnand %p441_p7, %p89_p8  ;;  %s102_s23 = sshll.u32 %s617_s22, 4  ;;  %s103_s23 = int_to_ptr.vmem [resolvable:$true] %s102_s23 }
   0xe   : > { %s536_s24 = scalar_lea.vmem %s103_s23, 16  ;;  %s543_s25 = scalar_lea.vmem %s103_s23, 32 }
   0xf   : > { %p470_p11 = pneg %p690_p10  ;;  %p537_p0 = scmp.ne.s32.totalorder %s103_s23, %s536_s24 }
  0x10   : > { %p544_p3 = scmp.lt.s32.totalorder %s103_s23, %s103_s23  ;;  %p545_p4 = scmp.lt.s32.totalorder %s543_s25, %s536_s24 }
  0x11   : > { %p471_p12 = pnand %p478_p9, %p470_p11 }
  0x12   : > { %p546_p7 = por %p545_p4, %p544_p3 }
  0x13   : > { %p527_p13 = pneg %p471_p12 }
  0x15   : > { %p539_p1 = pnand %p537_p0, %p527_p13 }
  0x17   : > { %p540_p2 = pneg %p539_p1 }
  0x19   : > { %p547_p8 = pnand %p546_p7, %p540_p2 }
  0x1b   : > { %550 = shalt.err (!%p547_p8)
}
  0x1c   : > { %473 = dma.hbm_to_vmem [thread:$0]  (!%p471_p12), %s783_s0, 16, %s103_s23, [#allocation3]  }
  0x1d   : > { %118 = sbr.rel (%p690_p10) target bundleno = 142 (0x8e), region = 28 }
  0x22   : > { %594 = dma.done.wait (%p478_p9), [#allocation3], 16  }
  0x23   : > { %596 = vsyncadd (%p478_p9), [#allocation3], 4294967280  ;;  %s446_s28 = sshll.u32 %s662_s13, 3  ;;  %v136_v0 = vlaneseq  ;;  %v447_v5 = vld [vmem:[#allocation2] ss:$0 sm:$0xff]  ;;  %s132_s3 = sand.u32 1, %s607_s10  }
  0x24   : > { %v138_v1 = vstv %s446_s28  ;;  %v618_v18 = vmov 683565275   ;;  %v619_v20 = vmov 2475754826   ;;  %v620_v22 = vmov 2131351028  }
  0x25   : > { %v708_v2 = vshrl.u32 %v136_v0, 7  ;;  %v621_v24 = vmov 2102212464   ;;  %v622_v26 = vmov 920167782   ;;  %s738_s4 = sshll.u32 %s132_s3, 3 }
  0x26   : > { %v623_v33 = vmov 1326507024   ;;  %s134_s5 = scalar_lea.vmem [#allocation5], %s738_s4  ;;  %s457_s7 = sshll.u32 %s662_s13, 7 }
  0x27   : > { %v139_v3 = vadd.s32 %v138_v1, %v708_v2  ;;  %s381_s6 = sshll.u32 %s134_s5, 4  ;;  %s379_s16 = scalar_lea.hbm %s785_s2, %s457_s7  ;;  %s743_s6 = int_to_ptr.vmem [resolvable:$true] %s381_s6 }
  0x28   : > { %s368_s13 = scalar_lea.sflag [#allocation4], %s132_s3  ;;  %s551_s17 = scalar_lea.vmem %s743_s6, 128 }
  0x29   : > { %v140_v4 = vcvt.s32.f32 %v139_v3  ;;  %p552_p9 = scmp.ne.s32.totalorder %s743_s6, %s551_s17  ;;  %s625_s21 = smov [#allocation5]  }
  0x2a   : > { %s555_s22 = sshll.u32 %s625_s21, 4  ;;  %s556_s22 = int_to_ptr.vmem [resolvable:$false] %s555_s22 }
  0x2b   : > { %v711_v6 = vmul.f32 %v447_v5, %v140_v4  ;;  %p553_p10 = pnand %p552_p9, %p679_p5  ;;  %s557_s23 = scalar_lea.vmem %s556_s22, 256 }
  0x2c   : > { %p558_p12 = scmp.lt.s32.totalorder %s743_s6, %s556_s22  ;;  %p559_p13 = scmp.lt.s32.totalorder %s557_s23, %s551_s17 }
  0x2d   : > { %v154_v7 = vand.u32 2139095040, %v711_v6  ;;  %v151_v9 = vand.u32 2147483647, %v711_v6  ;;  %vm153_vm7 = vcmp.lt.s32.totalorder %v711_v6, 0  ;;  %p554_p11 = pneg %p553_p10 }
  0x2e   : > { %p560_p0 = por %p559_p13, %p558_p12 }
  0x2f   : > { %v155_v8 = vshrl.u32 %v154_v7, 23  ;;  %v158_v12 = vand.u32 8388607, %v151_v9  ;;  %vm152_vm8 = vcmp.le.f32.partialorder %v151_v9, 0.7853982  ;;  %v624_v9 = vmov 0  }
  0x30   : > { %p561_p1 = pnand %p560_p0, %p554_p11 }
  0x31   : > { %v448_v10 = vadd.s32 4294967169, %v155_v8  ;;  %v159_v15 = vor.u32 8388608, %v158_v12 }
  0x33   : > { %v161_v11 = vadd.s32 1, %v448_v10  ;;  %v199_v35 = vshll.u32 %v159_v15, 8 }
  0x35   : > { %vm162_vm0 = vcmp.gt.s32.totalorder %v161_v11, 0 }
  0x36   : > { %v163_v13 = vsel %vm162_vm0, %v161_v11, 0  ;;  %vm243_vm0 = vweird.f32 %v711_v6 }
  0x37   : > { %v165_v14 = vand.u32 31, %v163_v13  ;;  %v164_v16 = vshrl.u32 %v163_v13, 5 }
  0x39   : > { %v166_v17 = vsub.s32 32, %v165_v14  ;;  %v168_v19 = vshll.u32 %v618_v18, %v165_v14  ;;  %v171_v21 = vshll.u32 %v619_v20, %v165_v14  ;;  %v174_v23 = vshll.u32 %v620_v22, %v165_v14 }
  0x3a   : > { %v177_v25 = vshll.u32 %v621_v24, %v165_v14  ;;  %v180_v27 = vshll.u32 %v622_v26, %v165_v14  ;;  %vm183_vm1 = vcmp.lt.s32.totalorder %v164_v16, 1  ;;  %vm186_vm2 = vcmp.lt.s32.totalorder %v164_v16, 4 }
  0x3b   : > { %v167_v28 = vshrl.u32 %v618_v18, %v166_v17  ;;  %v169_v29 = vshrl.u32 %v619_v20, %v166_v17  ;;  %v172_v30 = vshrl.u32 %v620_v22, %v166_v17  ;;  %v175_v31 = vshrl.u32 %v621_v24, %v166_v17 }
  0x3c   : > { %v178_v32 = vshrl.u32 %v622_v26, %v166_v17  ;;  %v181_v34 = vshrl.u32 %v623_v33, %v166_v17  ;;  %vm184_vm3 = vcmp.lt.s32.totalorder %v164_v16, 2  ;;  %vm185_vm4 = vcmp.lt.s32.totalorder %v164_v16, 3 }
  0x3d   : > { %v170_v36 = vor.u32 %v169_v29, %v168_v19  ;;  %v173_v37 = vor.u32 %v172_v30, %v171_v21  ;;  %v176_v38 = vor.u32 %v175_v31, %v174_v23  ;;  %v361_v31 = vsub.s32 0, %v708_v2 }
  0x3e   : > { %v179_v39 = vor.u32 %v178_v32, %v177_v25  ;;  %v182_v40 = vor.u32 %v181_v34, %v180_v27  ;;  %v149_v27 = vld [vmem:[%s784_s1] sm:$0x1] }
  0x3f   : > { %v187_v41 = vsel %vm183_vm1, %v167_v28, %v170_v36  ;;  %v188_v42 = vsel %vm186_vm2, %v176_v38, 2102212464  ;;  %v191_v43 = vsel %vm183_vm1, %v170_v36, %v173_v37  ;;  %v195_v44 = vsel %vm183_vm1, %v173_v37, %v176_v38 }
  0x40   : > { %v189_v45 = vsel %vm185_vm4, %v173_v37, %v188_v42  ;;  %v192_v46 = vsel %vm186_vm2, %v179_v39, 920167782  ;;  %v196_v47 = vsel %vm186_vm2, %v182_v40, 1326507024  ;;  %vm150_vm9 = vcmp.gt.f32.partialorder %v149_v27, 0.5 }
  0x41   : > { %v193_v48 = vsel %vm185_vm4, %v176_v38, %v192_v46  ;;  %v197_v49 = vsel %vm185_vm4, %v179_v39, %v196_v47  ;;  %v190_v50 = vsel %vm184_vm3, %v187_v41, %v189_v45  ;;  %v358_v32 = vsel %vm150_vm9, 1, %v624_v9 }
  0x42   : > { %v194_v51 = vsel %vm184_vm3, %v191_v43, %v193_v48  ;;  %v198_v52 = vsel %vm184_vm3, %v195_v44, %v197_v49  ;;  %v206_v57 = vmul.u32 %v199_v35, %v190_v50  ;;  %v362_v34 = vrot.slane %v358_v32, %v361_v31 }
  0x43   : > { %v717_v53 = vmul.u32.u64.low %v199_v35, %v198_v52  ;;  %v718_v54 = vmul.u32.u64.high %v199_v35, %v198_v52, %v717_v53  ;;  %v720_v55 = vmul.u32.u64.low %v199_v35, %v194_v51  ;;  %v721_v56 = vmul.u32.u64.high %v199_v35, %v194_v51, %v720_v55 }
  0x44   : > { %vm363_vm1 = vcmp.eq.s32.totalorder %v362_v34, 1  ;;  %vm365_vm2 = vcmask 261120  }
  0x45   : > { %vm208_vm5 = vc.u32 %v718_v54, %v720_v55  ;;  %v209_v58 = vadd.s32 1, %v721_v56  ;;  %v207_v7 = vadd.s32 %v720_v55, %v718_v54 }
  0x47   : > { %v210_v59 = vsel %vm208_vm5, %v209_v58, %v721_v56 }
  0x48   : > { %v211_v60 = vadd.s32 %v210_v59, %v206_v57 }
  0x4a   : > { %v212_v61 = vadd.s32 536870912, %v211_v60 }
  0x4c   : > { %v213_v62 = vshrl.u32 %v212_v61, 30 }
  0x4e   : > { %v214_v63 = vshll.u32 %v213_v62, 30  ;;  %v237_v21 = vsub.s32 4, %v213_v62 }
  0x50   : > { %v215_v0 = vsub.s32 %v211_v60, %v214_v63  ;;  %v238_v24 = vsel %vm153_vm7, %v237_v21, %v213_v62 }
  0x51   : > { %v240_v26 = vsel %vm152_vm8, 0, %v238_v24 }
  0x52   : > { %v217_v1 = vsub.s32 0, %v215_v0  ;;  %v347_v28 = vadd.s32 3, %v240_v26  ;;  %v244_v29 = vand.u32 3, %v240_v26 }
  0x54   : > { %v449_v3 = vmin.u32 %v217_v1, %v215_v0  ;;  %v348_v30 = vand.u32 3, %v347_v28  ;;  %vm249_vm10 = vcmp.eq.s32.totalorder %v244_v29, 2  ;;  %vm246_vm12 = vcmp.eq.s32.totalorder %v244_v29, 0 }
  0x55   : > { %vm245_vm14 = vcmp.lt.s32.totalorder %v244_v29, 2 }
  0x56   : > { %v219_v4 = vclz %v449_v3  ;;  %vm353_vm11 = vcmp.eq.s32.totalorder %v348_v30, 2  ;;  %vm350_vm13 = vcmp.eq.s32.totalorder %v348_v30, 0  ;;  %vm349_vm15 = vcmp.lt.s32.totalorder %v348_v30, 2 }
  0x58   : > { %v450_v5 = vadd.s32 4294967294, %v219_v4 }
  0x5a   : > { %vm451_vm6 = vcmp.lt.s32.totalorder %v450_v5, 0 }
  0x5b   : > { %v222_v8 = vsel %vm451_vm6, 0, %v450_v5 }
  0x5c   : > { %v223_v10 = vsub.s32 32, %v222_v8  ;;  %v224_v11 = vshll.u32 %v215_v0, %v222_v8  ;;  %v227_v12 = vsub.s32 4294967266, %v222_v8 }
  0x5e   : > { %v225_v13 = vshrl.u32 %v207_v7, %v223_v10  ;;  %v228_v14 = vadd.s32 127, %v227_v12 }
  0x60   : > { %v226_v15 = vor.u32 %v225_v13, %v224_v11  ;;  %v229_v16 = vshll.u32 %v228_v14, 23 }
  0x62   : > { %v230_v17 = vor.u32 4788187, %v229_v16  ;;  %v233_v18 = vcvt.s32.f32 %v226_v15 }
  0x64   : > { %v231_v19 = vand.u32 2147483647, %v230_v17 }
  0x66   : > { %v234_v20 = vmul.f32 %v233_v18, %v231_v19 }
  0x68   : > { %v235_v22 = vxor.u32 2147483648, %v234_v20 }
  0x6a   : > { %v236_v23 = vsel %vm153_vm7, %v235_v22, %v234_v20 }
  0x6b   : > { %v239_v25 = vsel %vm152_vm8, %v711_v6, %v236_v23 }
  0x6c   : > { %521 = vcosq.f32 %v239_v25 }
  0x6d   : > { %523 = vsinq.f32 %v239_v25 }
  0x79   : > { %v522_v33 = vpop.eup %521 }
  0x7a   : > { %v524_v35 = vpop.eup %523  ;;  %v250_v36 = vxor.u32 2147483648, %v522_v33 }
  0x7b   : > { %v247_v37 = vxor.u32 2147483648, %v524_v35 }
  0x7c   : > { %v251_v2 = vsel %vm249_vm10, %v250_v36, %v524_v35  ;;  %v355_v38 = vsel %vm353_vm11, %v250_v36, %v524_v35 }
  0x7d   : > { %v248_v39 = vsel %vm246_vm12, %v522_v33, %v247_v37  ;;  %v352_v40 = vsel %vm350_vm13, %v522_v33, %v247_v37 }
  0x7e   : > { %v252_v41 = vsel %vm245_vm14, %v248_v39, %v251_v2  ;;  %v356_v42 = vsel %vm349_vm15, %v352_v40, %v355_v38 }
  0x7f   : > { %v253_v43 = vsel %vm243_vm0, nan, %v252_v41  ;;  %v357_v44 = vsel %vm243_vm0, nan, %v356_v42 }
  0x80   : > { %v364_v6 = vsel %vm363_vm1, %v253_v43, %v357_v44 }
  0x81   : > { %366 = vst.msk [vmem:[%s134_s5] sm:$0xff] %vm365_vm2, %v364_v6 }
  0x82   : > { %564 = shalt.err (!%p561_p1)
}
  0x83   : > { %s565_s24 = scalar_lea.hbm %s379_s16, 128  ;;  %s569_s27 = scalar_lea.hbm %s785_s2, 256 }
  0x84   : > { %p566_p2 = scmp.ne.s32.totalorder %s379_s16, %s565_s24  ;;  %p570_p7 = scmp.lt.s32.totalorder %s379_s16, %s785_s2 }
  0x85   : > { %p571_p8 = scmp.lt.s32.totalorder %s569_s27, %s565_s24 }
  0x86   : > { %p567_p3 = pnand %p566_p2, %p679_p5 }
  0x87   : > { %p572_p9 = por %p571_p8, %p570_p7 }
  0x88   : > { %p568_p4 = pneg %p567_p3 }
  0x8a   : > { %p573_p10 = pnand %p572_p9, %p568_p4 }
  0x8c   : > { %576 = shalt.err (!%p573_p10)
}
  0x8d   : > { %468 = dma.vmem_to_hbm [thread:$0]  (%p679_p5), %s743_s6, 128, %s379_s16, %s368_s13  }
  0x8e PF: > { %p480_p11 = scmp.ge.s32.totalorder %s615_s12, 2  ;;  %s393_s30 = sand.u32 1, %s603_s9  }
  0x8f   : > { %s394_s3 = scalar_lea.sflag [#allocation4], %s393_s30 }
  0x90   : > { %p475_p12 = pnand %p480_p11, %p683_p6 }
  0x92   : > { %p476_p13 = pneg %p475_p12 }
  0x94   : > { %598 = dma.done.wait (%p476_p13), %s394_s3, 128  }
  0x95   : > { %600 = vsyncadd (%p476_p13), %s394_s3, 4294967168  ;;  %p13_p0 = scmp.ge.s32.totalorder %s666_s15, 4   ;;  %s789_s9 = smov %s607_s10 }
  0x96   : > { %s790_s10 = smov %s611_s11  ;;  %s791_s11 = smov %s677_s18 }
  0x97   : > { %s792_s12 = smov %s666_s15  ;;  %15 = sbr.rel (!%p13_p0) target bundleno = 4 (0x4), region = 65 }
  0x9c   :  { %399 = vsyncpa [#allocation3], 1 }
  0x9d   :  { %401 = vsyncpa [#allocation3 + $0x1], 1 }
  0x9e   :  { %402 = vsyncpa [#allocation4], 1 }
  0x9f   :  { %404 = vsyncpa [#allocation4 + $0x1], 1 }

</bundles_post_ra>
